<compile_context>
chip_gen: v5e
topology: v5e:2x2
jax: 0.10.0
libtpu: 0.0.40
codegen_flags: <defaults>
</compile_context>

<pallas_src>
import functools
import math

import jax
import jax.numpy as jnp
from jax.experimental import pallas as pl
from jax.experimental.pallas import tpu as pltpu


def _choose_block_rows(B, D, itemsize):
    # Aim for ~2 MiB per input block: 3 inputs x 2 buffers ~= 12 MiB live,
    # comfortably inside v7x's 32 MiB scoped-VMEM default (and v5e/v6e's 128 MiB).
    target_bytes = 2 * 1024 * 1024
    tb = (target_bytes // max(1, D * itemsize)) // 8 * 8
    tb = max(8, tb)
    if tb >= B:
        return B  # single full-extent block (any B, incl. B not a multiple of 8)
    return tb


def _quantile_loss_kernel(t_ref, mu_ref, sig_ref, out_ref, *,
                          z_vals, w_vals, c0, c1, total_rows, block_rows):
    # t/mu/sig_ref : VMEM (TB, D) tiles (any float dtype; upcast here)
    # out_ref      : VMEM (1, 1, D) lane-dense per-tile partial sum
    t = t_ref[...].astype(jnp.float32)
    mu = mu_ref[...].astype(jnp.float32)
    sig = sig_ref[...].astype(jnp.float32)

    e0 = t - mu  # hoisted out of the quantile loop

    # Linear part of the pinball sum, collapsed analytically:
    #   sum_i w_i*q_i*err_i = C0*e0 - C1*sig
    acc = jnp.float32(c0) * e0 - jnp.float32(c1) * sig

    # Hinge part: sum_i w_i * relu(sig*z_i - e0).  Q is tiny & static -> unrolled.
    for zi, wi in zip(z_vals, w_vals):
        acc = acc + jnp.float32(wi) * jnp.maximum(sig * jnp.float32(zi) - e0, 0.0)

    # Mask padded tail rows (only emitted when B is not a multiple of the row tile).
    if total_rows % block_rows != 0:
        row = jax.lax.broadcasted_iota(jnp.int32, acc.shape, 0)
        valid = (pl.program_id(0) * block_rows + row) < total_rows
        acc = jnp.where(valid, acc, 0.0)

    # One sublane reduce per tile; the final tiny reduce happens in plain JAX.
    out_ref[...] = jnp.sum(acc, axis=0, keepdims=True).reshape(1, 1, acc.shape[1])


def quantile_loss(target, pred_mu, pred_sigma, quantiles, quantile_weights, *,
                  block_rows=None):
    """Pallas implementation of QuantileLoss.forward (mean pinball loss)."""
    assert target.ndim == 2
    assert pred_mu.shape == target.shape and pred_sigma.shape == target.shape
    B, D = target.shape
    nq = len(quantiles)

    # Static per-quantile constants (quantiles/weights are module config, not tensors).
    q_vals = tuple(float(x) for x in quantiles)
    w_vals = tuple(float(x) for x in quantile_weights)
    z_vals = tuple(
        float(jax.scipy.special.erfinv(jnp.float32(2.0 * qq - 1.0)) * math.sqrt(2.0))
        for qq in q_vals
    )
    c0 = sum(wi * qi for wi, qi in zip(w_vals, q_vals))
    c1 = sum(wi * qi * zi for wi, qi, zi in zip(w_vals, q_vals, z_vals))

    itemsize = max(jnp.dtype(target.dtype).itemsize,
                   jnp.dtype(pred_mu.dtype).itemsize,
                   jnp.dtype(pred_sigma.dtype).itemsize)
    tb = block_rows if block_rows is not None else _choose_block_rows(B, D, itemsize)
    num_tiles = -(-B // tb)

    kernel = functools.partial(
        _quantile_loss_kernel,
        z_vals=z_vals, w_vals=w_vals, c0=c0, c1=c1,
        total_rows=B, block_rows=tb)

    block_bytes = tb * D * itemsize
    vmem_limit = int(min(max(12 * block_bytes, 16 * 1024 * 1024), 100 * 1024 * 1024))

    partials = pl.pallas_call(
        kernel,
        out_shape=jax.ShapeDtypeStruct((num_tiles, 1, D), jnp.float32),
        grid=(num_tiles,),
        in_specs=[
            pl.BlockSpec((tb, D), lambda i: (i, 0)),   # target
            pl.BlockSpec((tb, D), lambda i: (i, 0)),   # pred_mu
            pl.BlockSpec((tb, D), lambda i: (i, 0)),   # pred_sigma
        ],
        out_specs=pl.BlockSpec((1, 1, D), lambda i: (i, 0, 0)),
        compiler_params=pltpu.CompilerParams(
            dimension_semantics=("parallel",),         # independent tiles -> megacore on v7x
            vmem_limit_bytes=vmem_limit,
        ),
        cost_estimate=pl.CostEstimate(
            flops=(4 + 5 * nq) * B * D,
            transcendentals=0,
            bytes_accessed=3 * B * D * itemsize + num_tiles * D * 4,
        ),
    )(target, pred_mu, pred_sigma)

    return jnp.sum(partials) / jnp.float32(nq * B * D)


def _reference_loss(target, pred_mu, pred_sigma, quantiles, quantile_weights):
    """Pure-JAX reference mirroring the PyTorch forward."""
    t = target.astype(jnp.float32)
    mu = pred_mu.astype(jnp.float32)
    sig = pred_sigma.astype(jnp.float32)
    losses = []
    for q, w in zip(quantiles, quantile_weights):
        z = jnp.sqrt(2.0) * jax.scipy.special.erfinv(jnp.float32(2.0 * q - 1.0))
        err = t - (mu + sig * z)
        losses.append(jnp.maximum((q - 1.0) * err, q * err) * w)
    return jnp.mean(jnp.concatenate(losses, axis=1))


if __name__ == "__main__":
    # Static module config (QuantileLoss.__init__ arguments).
    quantiles = (0.1, 0.5, 0.9)
    quantile_weights = (0.3, 0.4, 0.3)

    key = jax.random.PRNGKey(0)
    k1, k2, k3, k4, k5, k6 = jax.random.split(key, 6)

    # Case 1: small, single full-extent block (auto tile choice).
    B, D = 64, 128
    target = jax.random.normal(k1, (B, D), dtype=jnp.float32)
    pred_mu = jax.random.normal(k2, (B, D), dtype=jnp.float32)
    pred_sigma = jax.nn.softplus(jax.random.normal(k3, (B, D), dtype=jnp.float32)) + 1e-3

    loss = jax.block_until_ready(
        quantile_loss(target, pred_mu, pred_sigma, quantiles, quantile_weights))
    ref = _reference_loss(target, pred_mu, pred_sigma, quantiles, quantile_weights)
    assert jnp.allclose(loss, ref, rtol=1e-5, atol=1e-5), (loss, ref)

    # Case 2: multi-tile grid with a padded (masked) tail block (B % TB != 0).
    B2, D2 = 20, 128
    t2 = jax.random.normal(k4, (B2, D2), dtype=jnp.float32)
    mu2 = jax.random.normal(k5, (B2, D2), dtype=jnp.float32)
    sig2 = jax.nn.softplus(jax.random.normal(k6, (B2, D2), dtype=jnp.float32)) + 1e-3

    loss2 = jax.block_until_ready(
        quantile_loss(t2, mu2, sig2, quantiles, quantile_weights, block_rows=8))
    ref2 = _reference_loss(t2, mu2, sig2, quantiles, quantile_weights)
    assert jnp.allclose(loss2, ref2, rtol=1e-5, atol=1e-5), (loss2, ref2)

    print("KERNEL_OK")
</pallas_src>

<mosaic_0001>
module attributes {stable_mosaic.version = 11 : i64} {
  func.func @_quantile_loss_kernel(%arg0: i32, %arg1: memref<64x128xf32, #tpu.memory_space<vmem>>, %arg2: memref<64x128xf32, #tpu.memory_space<vmem>>, %arg3: memref<64x128xf32, #tpu.memory_space<vmem>>, %arg4: memref<1x1x128xf32, #tpu.memory_space<vmem>>) attributes {dimension_semantics = [#tpu.dimension_semantics<parallel>], iteration_bounds = array<i64: 1>, scalar_prefetch = 0 : i64, scratch_operands = 0 : i64, tpu.core_type = #tpu.core_type<tc>, window_params = [{transform_indices = @transform_0, window_bounds = array<i64: 64, 128>}, {transform_indices = @transform_1, window_bounds = array<i64: 64, 128>}, {transform_indices = @transform_2, window_bounds = array<i64: 64, 128>}, {transform_indices = @transform_3, window_bounds = array<i64: 1, 1, 128>}]} {
    %c0 = arith.constant 0 : index
    %c0_0 = arith.constant 0 : index
    %0 = vector.load %arg1[%c0, %c0_0] : memref<64x128xf32, #tpu.memory_space<vmem>>, vector<64x128xf32>
    %c0_1 = arith.constant 0 : index
    %c0_2 = arith.constant 0 : index
    %1 = vector.load %arg2[%c0_1, %c0_2] : memref<64x128xf32, #tpu.memory_space<vmem>>, vector<64x128xf32>
    %c0_3 = arith.constant 0 : index
    %c0_4 = arith.constant 0 : index
    %2 = vector.load %arg3[%c0_3, %c0_4] : memref<64x128xf32, #tpu.memory_space<vmem>>, vector<64x128xf32>
    %3 = arith.subf %0, %1 : vector<64x128xf32>
    %cst = arith.constant 5.000000e-01 : f32
    %4 = vector.broadcast %cst : f32 to vector<64x128xf32>
    %5 = arith.mulf %4, %3 : vector<64x128xf32>
    %cst_5 = arith.constant 0.307572424 : f32
    %6 = vector.broadcast %cst_5 : f32 to vector<64x128xf32>
    %7 = arith.mulf %6, %2 : vector<64x128xf32>
    %8 = arith.subf %5, %7 : vector<64x128xf32>
    %cst_6 = arith.constant -1.28155172 : f32
    %9 = vector.broadcast %cst_6 : f32 to vector<64x128xf32>
    %10 = arith.mulf %2, %9 : vector<64x128xf32>
    %11 = arith.subf %10, %3 : vector<64x128xf32>
    %cst_7 = arith.constant 0.000000e+00 : f32
    %12 = vector.broadcast %cst_7 : f32 to vector<64x128xf32>
    %13 = arith.maximumf %11, %12 : vector<64x128xf32>
    %cst_8 = arith.constant 3.000000e-01 : f32
    %14 = vector.broadcast %cst_8 : f32 to vector<64x128xf32>
    %15 = arith.mulf %14, %13 : vector<64x128xf32>
    %16 = arith.addf %8, %15 : vector<64x128xf32>
    %cst_9 = arith.constant 0.000000e+00 : f32
    %17 = vector.broadcast %cst_9 : f32 to vector<64x128xf32>
    %18 = arith.mulf %2, %17 : vector<64x128xf32>
    %19 = arith.subf %18, %3 : vector<64x128xf32>
    %cst_10 = arith.constant 0.000000e+00 : f32
    %20 = vector.broadcast %cst_10 : f32 to vector<64x128xf32>
    %21 = arith.maximumf %19, %20 : vector<64x128xf32>
    %cst_11 = arith.constant 4.000000e-01 : f32
    %22 = vector.broadcast %cst_11 : f32 to vector<64x128xf32>
    %23 = arith.mulf %22, %21 : vector<64x128xf32>
    %24 = arith.addf %16, %23 : vector<64x128xf32>
    %cst_12 = arith.constant 1.28155172 : f32
    %25 = vector.broadcast %cst_12 : f32 to vector<64x128xf32>
    %26 = arith.mulf %2, %25 : vector<64x128xf32>
    %27 = arith.subf %26, %3 : vector<64x128xf32>
    %cst_13 = arith.constant 0.000000e+00 : f32
    %28 = vector.broadcast %cst_13 : f32 to vector<64x128xf32>
    %29 = arith.maximumf %27, %28 : vector<64x128xf32>
    %cst_14 = arith.constant 3.000000e-01 : f32
    %30 = vector.broadcast %cst_14 : f32 to vector<64x128xf32>
    %31 = arith.mulf %30, %29 : vector<64x128xf32>
    %32 = arith.addf %24, %31 : vector<64x128xf32>
    %cst_15 = arith.constant dense<0.000000e+00> : vector<128xf32>
    %33 = vector.multi_reduction <add>, %32, %cst_15 [0] : vector<64x128xf32> to vector<128xf32>
    %34 = vector.shape_cast %33 : vector<128xf32> to vector<1x128xf32>
    %35 = vector.shape_cast %34 : vector<1x128xf32> to vector<1x1x128xf32>
    %c0_16 = arith.constant 0 : index
    %c0_17 = arith.constant 0 : index
    %c0_18 = arith.constant 0 : index
    %36 = vector.load %arg4[%c0_16, %c0_17, %c0_18] : memref<1x1x128xf32, #tpu.memory_space<vmem>>, vector<1x1x128xf32>
    tpu.vector_store %arg4[%c0_16, %c0_17, %c0_18], %35 {strides = array<i32>} : memref<1x1x128xf32, #tpu.memory_space<vmem>>, vector<1x1x128xf32>,
    return
  }
  func.func @transform_0(%arg0: i32) -> (i32, i32) {
    %c0_i32 = arith.constant 0 : i32
    %c0_i32_0 = arith.constant 0 : i32
    return %arg0, %c0_i32 : i32, i32
  }
  func.func @transform_1(%arg0: i32) -> (i32, i32) {
    %c0_i32 = arith.constant 0 : i32
    %c0_i32_0 = arith.constant 0 : i32
    return %arg0, %c0_i32 : i32, i32
  }
  func.func @transform_2(%arg0: i32) -> (i32, i32) {
    %c0_i32 = arith.constant 0 : i32
    %c0_i32_0 = arith.constant 0 : i32
    return %arg0, %c0_i32 : i32, i32
  }
  func.func @transform_3(%arg0: i32) -> (i32, i32, i32) {
    %c0_i32 = arith.constant 0 : i32
    %c0_i32_0 = arith.constant 0 : i32
    %c0_i32_1 = arith.constant 0 : i32
    return %arg0, %c0_i32, %c0_i32_0 : i32, i32, i32
  }
}

</mosaic_0001>

<bundles_post_ra>
// kernel: tpu_custom_call.1
= control target key start
LH: loop header
LB: loop body
LE: loop exit
PB: predicated region body
PF: predicated region fallthrough
CT: control target
= control target key end

     0   :  { %8 = vsyncpa [#allocation3], 0  ;;  %s560_s0 = inlined_call_operand.hbm [shape: f32[64,128], index: 0, kind: input, shape index: {}]   ;;  %s561_s1 = inlined_call_operand.hbm [shape: f32[64,128], index: 1, kind: input, shape index: {}]   ;;  %s562_s2 = inlined_call_operand.hbm [shape: f32[64,128], index: 2, kind: input, shape index: {}]   ;;  %s563_s3 = inlined_call_operand.hbm [shape: f32[1,1,128], index: 3, kind: output, shape index: {}]  }
   0x1   :  { %9 = vsyncpa [#allocation6], 0 }
   0x2   :  { %10 = vsyncpa [#allocation4], 0  ;;  %s28_s14 = sshll.u32 %s561_s1, 4  ;;  %s378_s15 = smov [#allocation5]   ;;  %s29_s14 = int_to_ptr.hbm [resolvable:$true] %s28_s14 }
   0x3   :  { %s30_s16 = sshll.u32 %s378_s15, 4  ;;  %s15_s19 = sshll.u32 %s560_s0, 4  ;;  %s31_s16 = int_to_ptr.vmem [resolvable:$true] %s30_s16  ;;  %s16_s19 = int_to_ptr.hbm [resolvable:$true] %s15_s19 }
   0x4   :  { %s379_s20 = smov 128   ;;  %s380_s21 = smov 8  }
   0x5   :  { %36 = dma.hbm_to_vmem [thread:$0]  %s29_s14, 1024, %s31_s16, [#allocation6], %s379_s20, %s379_s20, %s380_s21  }
   0x6   :  { %s381_s22 = smov [#allocation2]   ;;  %s41_s26 = sshll.u32 %s562_s2, 4  ;;  %s42_s26 = int_to_ptr.hbm [resolvable:$true] %s41_s26 }
   0x7   :  { %s17_s23 = sshll.u32 %s381_s22, 4  ;;  %s382_s1 = smov [#allocation7]   ;;  %s18_s23 = int_to_ptr.vmem [resolvable:$true] %s17_s23 }
   0x8   :  { %23 = dma.hbm_to_vmem [thread:$0]  %s16_s19, 1024, %s18_s23, [#allocation3], %s379_s20, %s379_s20, %s380_s21  }
   0x9   :  { %s43_s27 = sshll.u32 %s382_s1, 4  ;;  %s44_s27 = int_to_ptr.vmem [resolvable:$true] %s43_s27 }
   0xa   :  { %49 = dma.hbm_to_vmem [thread:$0]  %s42_s26, 1024, %s44_s27, [#allocation6], %s379_s20, %s379_s20, %s380_s21  }
   0xb   :  { %372 = dma.done.wait [#allocation3], 1024  }
   0xc   :  { %373 = vsyncadd [#allocation3], 4294966272 }
   0xd   :  { %374 = dma.done.wait [#allocation6], 2048  }
   0xe   :  { %375 = vsyncadd [#allocation6], 4294965248  ;;  %v62_v0 = vld [vmem:[#allocation2] sm:$0xff]  ;;  %v63_v1 = vld [vmem:[#allocation2 + $0x8] sm:$0xff]  ;;  %s383_s0 = smov [#allocation8]   ;;  %s259_s30 = sshll.u32 %s563_s3, 4  ;;  %s260_s30 = int_to_ptr.hbm [resolvable:$true] %s259_s30 }
   0xf   :  { %v64_v2 = vld [vmem:[#allocation2 + $0x10] sm:$0xff]  ;;  %v65_v3 = vld [vmem:[#allocation2 + $0x18] sm:$0xff]  ;;  %v66_v4 = vld [vmem:[#allocation2 + $0x20] sm:$0xff]  ;;  %s257_s2 = sshll.u32 %s383_s0, 4  ;;  %s258_s2 = int_to_ptr.vmem [resolvable:$true] %s257_s2 }
  0x10   :  { %v67_v5 = vld [vmem:[#allocation2 + $0x28] sm:$0xff]  ;;  %v68_v6 = vld [vmem:[#allocation2 + $0x30] sm:$0xff]  ;;  %v70_v7 = vld [vmem:[#allocation5] sm:$0xff] }
  0x11   :  { %v71_v8 = vld [vmem:[#allocation5 + $0x8] sm:$0xff]  ;;  %v72_v9 = vld [vmem:[#allocation5 + $0x10] sm:$0xff]  ;;  %v73_v10 = vld [vmem:[#allocation5 + $0x18] sm:$0xff]  ;;  %v413_v16 = vsub.f32 %v62_v0, %v70_v7 }
  0x12   :  { %v74_v11 = vld [vmem:[#allocation5 + $0x20] sm:$0xff]  ;;  %v75_v12 = vld [vmem:[#allocation5 + $0x28] sm:$0xff]  ;;  %v76_v13 = vld [vmem:[#allocation5 + $0x30] sm:$0xff]  ;;  %v415_v17 = vsub.f32 %v63_v1, %v71_v8  ;;  %v417_v18 = vsub.f32 %v64_v2, %v72_v9  ;;  %v419_v19 = vsub.f32 %v65_v3, %v73_v10 }
  0x13   :  { %v69_v14 = vld [vmem:[#allocation2 + $0x38] sm:$0xff]  ;;  %v421_v20 = vld [vmem:[#allocation7] sm:$0xff]  ;;  %v423_v21 = vld [vmem:[#allocation7 + $0x8] sm:$0xff]  ;;  %v427_v23 = vsub.f32 %v66_v4, %v74_v11  ;;  %v429_v24 = vsub.f32 %v67_v5, %v75_v12  ;;  %v431_v25 = vsub.f32 %v68_v6, %v76_v13  ;;  %v434_v26 = vmul.f32 0.5, %v413_v16 }
  0x14   :  { %v77_v15 = vld [vmem:[#allocation5 + $0x38] sm:$0xff]  ;;  %v425_v22 = vld [vmem:[#allocation7 + $0x10] sm:$0xff]  ;;  %v438_v28 = vld [vmem:[#allocation7 + $0x20] sm:$0xff]  ;;  %v445_v31 = vmul.f32 0.5, %v415_v17  ;;  %v448_v32 = vmul.f32 0.5, %v417_v18  ;;  %v451_v33 = vmul.f32 0.5, %v419_v19 }
  0x15   :  { %v436_v27 = vld [vmem:[#allocation7 + $0x18] sm:$0xff]  ;;  %v440_v29 = vld [vmem:[#allocation7 + $0x28] sm:$0xff]  ;;  %v442_v30 = vsub.f32 %v69_v14, %v77_v15  ;;  %v453_v34 = vld [vmem:[#allocation7 + $0x30] sm:$0xff]  ;;  %v458_v36 = vmul.f32 0.5, %v427_v23  ;;  %v461_v37 = vmul.f32 0.5, %v429_v24  ;;  %v464_v38 = vmul.f32 0.5, %v431_v25 }
  0x16   :  { %v455_v35 = vld [vmem:[#allocation7 + $0x38] sm:$0xff]  ;;  %v102_v39 = vmul.f32 0.30757242, %v421_v20  ;;  %v471_v41 = vmul.f32 0.30757242, %v423_v21  ;;  %v158_v43 = vmul.f32 0.0, %v421_v20 }
  0x17   :  { %v468_v40 = vmul.f32 0.5, %v442_v30  ;;  %v474_v42 = vmul.f32 0.30757242, %v425_v22  ;;  %v478_v44 = vmul.f32 0.30757242, %v436_v27 }
  0x18   :  { %v481_v45 = vmul.f32 0.30757242, %v438_v28  ;;  %v484_v46 = vmul.f32 0.30757242, %v440_v29  ;;  %v487_v47 = vmul.f32 0.30757242, %v453_v34  ;;  %v110_v61 = vsub.f32 %v434_v26, %v102_v39 }
  0x19   :  { %v490_v48 = vmul.f32 0.30757242, %v455_v35  ;;  %v118_v49 = vmul.f32 -1.2815517, %v421_v20  ;;  %v119_v50 = vmul.f32 -1.2815517, %v423_v21  ;;  %v111_v1 = vsub.f32 %v445_v31, %v471_v41 }
  0x1a   :  { %v120_v51 = vmul.f32 -1.2815517, %v425_v22  ;;  %v121_v52 = vmul.f32 -1.2815517, %v436_v27  ;;  %v122_v53 = vmul.f32 -1.2815517, %v438_v28  ;;  %v112_v5 = vsub.f32 %v448_v32, %v474_v42 }
  0x1b   :  { %v123_v54 = vmul.f32 -1.2815517, %v440_v29  ;;  %v124_v55 = vmul.f32 -1.2815517, %v453_v34  ;;  %v126_v56 = vsub.f32 %v118_v49, %v413_v16  ;;  %v125_v57 = vmul.f32 -1.2815517, %v455_v35 }
  0x1c   :  { %v127_v58 = vsub.f32 %v119_v50, %v415_v17  ;;  %v128_v59 = vsub.f32 %v120_v51, %v417_v18  ;;  %v129_v60 = vsub.f32 %v121_v52, %v419_v19  ;;  %v130_v62 = vsub.f32 %v122_v53, %v427_v23 }
  0x1d   :  { %v131_v63 = vsub.f32 %v123_v54, %v429_v24  ;;  %v134_v0 = vmax.f32 %v126_v56, 0.0  ;;  %v132_v2 = vsub.f32 %v124_v55, %v431_v25  ;;  %v133_v6 = vsub.f32 %v125_v57, %v442_v30 }
  0x1e   :  { %v135_v3 = vmax.f32 %v127_v58, 0.0  ;;  %v136_v4 = vmax.f32 %v128_v59, 0.0  ;;  %v137_v7 = vmax.f32 %v129_v60, 0.0  ;;  %v138_v8 = vmax.f32 %v130_v62, 0.0 }
  0x1f   :  { %v113_v9 = vsub.f32 %v451_v33, %v478_v44  ;;  %v114_v10 = vsub.f32 %v458_v36, %v481_v45  ;;  %v139_v11 = vmax.f32 %v131_v63, 0.0  ;;  %v142_v12 = vmul.f32 0.3, %v134_v0 }
  0x20   :  { %v115_v13 = vsub.f32 %v461_v37, %v484_v46  ;;  %v116_v14 = vsub.f32 %v464_v38, %v487_v47  ;;  %v117_v15 = vsub.f32 %v468_v40, %v490_v48  ;;  %v159_v26 = vmul.f32 0.0, %v423_v21 }
  0x21   :  { %v140_v31 = vmax.f32 %v132_v2, 0.0  ;;  %v143_v32 = vmul.f32 0.3, %v135_v3  ;;  %v144_v39 = vmul.f32 0.3, %v136_v4  ;;  %v166_v33 = vsub.f32 %v158_v43, %v413_v16 }
  0x22   :  { %v141_v41 = vmax.f32 %v133_v6, 0.0  ;;  %v145_v36 = vmul.f32 0.3, %v137_v7  ;;  %v146_v42 = vmul.f32 0.3, %v138_v8  ;;  %v160_v44 = vmul.f32 0.0, %v425_v22 }
  0x23   :  { %v147_v45 = vmul.f32 0.3, %v139_v11  ;;  %v150_v37 = vadd.f32 %v142_v12, %v110_v61  ;;  %v161_v46 = vmul.f32 0.0, %v436_v27  ;;  %v162_v38 = vmul.f32 0.0, %v438_v28 }
  0x24   :  { %v163_v47 = vmul.f32 0.0, %v440_v29  ;;  %v164_v49 = vmul.f32 0.0, %v453_v34  ;;  %v165_v50 = vmul.f32 0.0, %v455_v35  ;;  %v167_v51 = vsub.f32 %v159_v26, %v415_v17 }
  0x25   :  { %v168_v43 = vsub.f32 %v160_v44, %v417_v18  ;;  %v169_v52 = vsub.f32 %v161_v46, %v419_v19  ;;  %v170_v53 = vsub.f32 %v162_v38, %v427_v23  ;;  %v174_v54 = vmax.f32 %v166_v33, 0.0 }
  0x26   :  { %v171_v55 = vsub.f32 %v163_v47, %v429_v24  ;;  %v172_v56 = vsub.f32 %v164_v49, %v431_v25  ;;  %v173_v57 = vsub.f32 %v165_v50, %v442_v30  ;;  %v175_v58 = vmax.f32 %v167_v51, 0.0 }
  0x27   :  { %v148_v59 = vmul.f32 0.3, %v140_v31  ;;  %v176_v60 = vmax.f32 %v168_v43, 0.0  ;;  %v177_v61 = vmax.f32 %v169_v52, 0.0  ;;  %v178_v62 = vmax.f32 %v170_v53, 0.0 }
  0x28   :  { %v151_v63 = vadd.f32 %v143_v32, %v111_v1  ;;  %v179_v0 = vmax.f32 %v171_v55, 0.0  ;;  %v182_v2 = vmul.f32 0.4, %v174_v54  ;;  %v183_v3 = vmul.f32 0.4, %v175_v58 }
  0x29   :  { %v149_v4 = vmul.f32 0.3, %v141_v41  ;;  %v152_v6 = vadd.f32 %v144_v39, %v112_v5  ;;  %v153_v7 = vadd.f32 %v145_v36, %v113_v9  ;;  %v154_v8 = vadd.f32 %v146_v42, %v114_v10 }
  0x2a   :  { %v155_v11 = vadd.f32 %v147_v45, %v115_v13  ;;  %v180_v12 = vmax.f32 %v172_v56, 0.0  ;;  %v181_v26 = vmax.f32 %v173_v57, 0.0  ;;  %v184_v33 = vmul.f32 0.4, %v176_v60 }
  0x2b   :  { %v156_v44 = vadd.f32 %v148_v59, %v116_v14  ;;  %v185_v46 = vmul.f32 0.4, %v177_v61  ;;  %v186_v38 = vmul.f32 0.4, %v178_v62  ;;  %v198_v31 = vmul.f32 1.2815517, %v421_v20 }
  0x2c   :  { %v187_v47 = vmul.f32 0.4, %v179_v0  ;;  %v190_v49 = vadd.f32 %v182_v2, %v150_v37  ;;  %v191_v50 = vadd.f32 %v183_v3, %v151_v63  ;;  %v199_v1 = vmul.f32 1.2815517, %v423_v21 }
  0x2d   :  { %v200_v32 = vmul.f32 1.2815517, %v425_v22  ;;  %v201_v5 = vmul.f32 1.2815517, %v436_v27  ;;  %v202_v9 = vmul.f32 1.2815517, %v438_v28  ;;  %v206_v10 = vsub.f32 %v198_v31, %v413_v16 }
  0x2e   :  { %v203_v13 = vmul.f32 1.2815517, %v440_v29  ;;  %v204_v14 = vmul.f32 1.2815517, %v453_v34  ;;  %v205_v39 = vmul.f32 1.2815517, %v455_v35  ;;  %v207_v20 = vsub.f32 %v199_v1, %v415_v17 }
  0x2f   :  { %v208_v41 = vsub.f32 %v200_v32, %v417_v18  ;;  %v209_v21 = vsub.f32 %v201_v5, %v419_v19  ;;  %v210_v22 = vsub.f32 %v202_v9, %v427_v23  ;;  %v214_v36 = vmax.f32 %v206_v10, 0.0 }
  0x30   :  { %v192_v27 = vadd.f32 %v184_v33, %v152_v6  ;;  %v211_v28 = vsub.f32 %v203_v13, %v429_v24  ;;  %v212_v16 = vsub.f32 %v204_v14, %v431_v25  ;;  %v215_v42 = vmax.f32 %v207_v20, 0.0 }
  0x31   :  { %v216_v29 = vmax.f32 %v208_v41, 0.0  ;;  %v217_v45 = vmax.f32 %v209_v21, 0.0  ;;  %v218_v34 = vmax.f32 %v210_v22, 0.0  ;;  %v222_v37 = vmul.f32 0.3, %v214_v36 }
  0x32   :  { %v193_v35 = vadd.f32 %v185_v46, %v153_v7  ;;  %v213_v17 = vsub.f32 %v205_v39, %v442_v30  ;;  %v219_v51 = vmax.f32 %v211_v28, 0.0  ;;  %v223_v18 = vmul.f32 0.3, %v215_v42 }
  0x33   :  { %v188_v43 = vmul.f32 0.4, %v180_v12  ;;  %v224_v19 = vmul.f32 0.3, %v216_v29  ;;  %v225_v52 = vmul.f32 0.3, %v217_v45  ;;  %v230_v23 = vadd.f32 %v222_v37, %v190_v49 }
  0x34   :  { %v194_v53 = vadd.f32 %v186_v38, %v154_v8  ;;  %v220_v54 = vmax.f32 %v212_v16, 0.0  ;;  %v226_v55 = vmul.f32 0.3, %v218_v34  ;;  %v231_v24 = vadd.f32 %v223_v18, %v191_v50 }
  0x35   :  { %v157_v25 = vadd.f32 %v149_v4, %v117_v15  ;;  %v189_v56 = vmul.f32 0.4, %v181_v26  ;;  %v195_v57 = vadd.f32 %v187_v47, %v155_v11  ;;  %v232_v58 = vadd.f32 %v224_v19, %v192_v27 }
  0x36   :  { %v221_v59 = vmax.f32 %v213_v17, 0.0  ;;  %v227_v60 = vmul.f32 0.3, %v219_v51  ;;  %v233_v30 = vadd.f32 %v225_v52, %v193_v35  ;;  %v238_v61 = vadd.f32 %v231_v24, %v230_v23 }
  0x37   :  { %v196_v62 = vadd.f32 %v188_v43, %v156_v44  ;;  %v228_v63 = vmul.f32 0.3, %v220_v54  ;;  %v234_v0 = vadd.f32 %v226_v55, %v194_v53  ;;  %v197_v3 = vadd.f32 %v189_v56, %v157_v25 }
  0x38   :  { %v239_v2 = vadd.f32 %v238_v61, %v232_v58  ;;  %v229_v6 = vmul.f32 0.3, %v221_v59  ;;  %v235_v7 = vadd.f32 %v227_v60, %v195_v57 }
  0x39   :  { %v236_v12 = vadd.f32 %v228_v63, %v196_v62 }
  0x3a   :  { %v240_v8 = vadd.f32 %v239_v2, %v233_v30  ;;  %v237_v46 = vadd.f32 %v229_v6, %v197_v3 }
  0x3c   :  { %v241_v33 = vadd.f32 %v240_v8, %v234_v0 }
  0x3e   :  { %v242_v40 = vadd.f32 %v241_v33, %v235_v7 }
  0x40   :  { %v243_v48 = vadd.f32 %v242_v40, %v236_v12 }
  0x42   :  { %v244_v15 = vadd.f32 %v243_v48, %v237_v46 }
  0x44   :  { %v245_v4 = vrot.slane %v244_v15, 4 }
  0x46   :  { %v246_v11 = vadd.f32 %v245_v4, %v244_v15 }
  0x48   :  { %v247_v26 = vrot.slane %v246_v11, 2 }
  0x4a   :  { %v248_v38 = vadd.f32 %v247_v26, %v246_v11 }
  0x4c   :  { %v249_v44 = vrot.slane %v248_v38, 1 }
  0x4e   :  { %v250_v31 = vadd.f32 %v249_v44, %v248_v38 }
  0x50   :  { %251 = vst [vmem:[#allocation8] sm:$0x1] %v250_v31 }
  0x51   :  { %262 = dma.vmem_to_hbm [thread:$0]  %s258_s2, 16, %s260_s30, [#allocation4]  }
  0x52   :  { %376 = dma.done.wait [#allocation4], 16  }
  0x53   :  { %377 = vsyncadd [#allocation4], 4294967280 }
  0x54   :  { %267 = vsyncpa [#allocation3], 1 }
  0x55   :  { %268 = vsyncpa [#allocation6], 1 }
  0x56   :  { %269 = vsyncpa [#allocation4], 1 }

</bundles_post_ra>
